<compile_context>
chip_gen: v6e
topology: v6e:2x2x1
jax: 0.10.0
libtpu: 0.0.40
codegen_flags: <defaults>
</compile_context>

<pallas_src>
import functools

import jax
import jax.numpy as jnp
from jax.experimental import pallas as pl
from jax.experimental.pallas import tpu as pltpu

_LANE = 128
_SUBLANE = 8
_NEG_INF = -1e30  # bias pad value for the final layer's padded logit columns


def _round_up(x, m):
    return ((x + m - 1) // m) * m


def _cdiv(a, b):
    return (a + b - 1) // b


def _netsoftmax_kernel(x_ref,
                       w0, b0, w1, b1, w2, b2, w3, b3, w4, b4, w5, b5, w6, b6,
                       out_ref, *, act_dtype, mm_dtype, output_dim):
    """Fused forward for one (block_b, input_dim) batch tile.

    MXU matmuls run in `mm_dtype` with f32 accumulation; tanh runs in
    `act_dtype` (f32 on v5e, bf16 on v6e/v7x); log_softmax is always f32.
    """
    def hidden(h, w_ref, b_ref):
        acc = jnp.dot(h, w_ref[...], preferred_element_type=jnp.float32)
        acc = acc + b_ref[...].astype(jnp.float32)
        return jnp.tanh(acc.astype(act_dtype)).astype(mm_dtype)

    h = x_ref[...].astype(mm_dtype)   # no-op if wrapper already cast to bf16
    h = hidden(h, w0, b0)
    h = hidden(h, w1, b1)
    h = hidden(h, w2, b2)
    h = hidden(h, w3, b3)
    h = hidden(h, w4, b4)
    h = hidden(h, w5, b5)

    # Final layer.  Padded logit columns carry a -1e30 bias (kept f32), so
    # exp() underflows to exactly 0 and the lane-dense 128-wide logsumexp
    # equals the true logsumexp over the real output_dim columns.
    logits = (jnp.dot(h, w6[...], preferred_element_type=jnp.float32)
              + b6[...].astype(jnp.float32))
    m = jnp.max(logits, axis=-1, keepdims=True)
    shifted = logits - m
    lse = jnp.log(jnp.sum(jnp.exp(shifted), axis=-1, keepdims=True))
    # Store only the real columns (masked lane store; store slot has slack).
    out_ref[...] = (shifted - lse)[:, :output_dim].astype(out_ref.dtype)


def netsoftmax_forward(x, params, *, block_b=1024, matmul_dtype=jnp.bfloat16,
                       activation_dtype=jnp.float32, min_batch_tiles=2):
    """x: (B, input_dim).  params: list of (W, b), W:(in,out), b:(1,out),
    i.e. x @ W + b == PyTorch x @ W.T + b.

    matmul_dtype: MXU operand dtype.  bf16 halves input DMA and MXU time but
      loses input mantissa (~1e-2-level logit error; intentional).
    activation_dtype: tanh / inter-layer dtype.  bf16 on v6e/v7x (bf16 EUP
      path, ~2x on the tanh-bound portion); keep f32 on v5e.
    min_batch_tiles: lower bound on batch tiles so the "parallel" grid axis
      can shard across both v7x TensorCores.
    """
    B, input_dim = x.shape
    output_dim = params[-1][0].shape[1]
    hidden_dim = params[0][0].shape[1]
    n_layers = len(params)

    hid_pad = _round_up(hidden_dim, _LANE)
    out_pad = _round_up(output_dim, _LANE)

    # --- pad weights / biases ------------------------------------------------
    # Layer 0 keeps its real (small) K = input_dim (Mosaic masks the matmul);
    # hidden feature dims are padded to 128 for lane-dense activations; the
    # final layer's padded logit columns get a -1e30 f32 bias.
    flat_params = []
    for li, (w, b) in enumerate(params):
        fi = input_dim if li == 0 else hid_pad
        fo = out_pad if li == n_layers - 1 else hid_pad
        wp = jnp.zeros((fi, fo), jnp.float32).at[:w.shape[0], :w.shape[1]].set(w)
        pad_val = _NEG_INF if li == n_layers - 1 else 0.0
        bp = jnp.full((1, fo), pad_val, jnp.float32).at[:, :b.shape[1]].set(b)
        flat_params.extend([wp.astype(matmul_dtype), bp])

    # --- batch tiling ----------------------------------------------------------
    B_round = _round_up(B, _SUBLANE)
    n_tiles = max(_cdiv(B_round, block_b), 1)
    if min_batch_tiles > 1 and B_round >= min_batch_tiles * _SUBLANE:
        n_tiles = max(n_tiles, min_batch_tiles)          # v7x megacore sharding
    eff_block = _round_up(_cdiv(B_round, n_tiles), _SUBLANE)
    B_pad = n_tiles * eff_block

    x_cast = x.astype(matmul_dtype)        # bf16 input DMA when bf16 MXU
    if B_pad == B:
        x_in = x_cast
    else:
        x_in = jnp.zeros((B_pad, input_dim), matmul_dtype).at[:B].set(x_cast)

    # --- specs -----------------------------------------------------------------
    in_specs = [pl.BlockSpec((eff_block, input_dim), lambda i: (i, 0))]
    for p in flat_params:
        in_specs.append(pl.BlockSpec(p.shape, lambda i: (0, 0)))
    out_spec = pl.BlockSpec((eff_block, output_dim), lambda i: (i, 0))

    kernel = functools.partial(_netsoftmax_kernel,
                               act_dtype=activation_dtype,
                               mm_dtype=matmul_dtype,
                               output_dim=output_dim)

    # Advisory cost estimate for XLA's scheduler.
    flops = 2 * B_pad * (input_dim * hid_pad + 5 * hid_pad * hid_pad
                         + hid_pad * out_pad)
    transcendentals = B_pad * (6 * hid_pad + out_pad + 1)
    param_bytes = sum(int(p.size) * p.dtype.itemsize for p in flat_params)
    bytes_accessed = (int(x_in.size) * x_in.dtype.itemsize
                      + B_pad * output_dim * 4 + param_bytes)

    # Rough VMEM footprint: double-buffered x/out tiles + a few live f32
    # activation tiles + double-buffered params.  Only raise the scoped limit
    # if we'd exceed the conservative v5e default.
    vmem_est = (2 * eff_block * (input_dim * jnp.dtype(matmul_dtype).itemsize
                                 + output_dim * 4)
                + 4 * eff_block * hid_pad * 4
                + 2 * param_bytes)
    vmem_limit = 64 * 1024 * 1024 if vmem_est > 12 * 1024 * 1024 else None

    out = pl.pallas_call(
        kernel,
        out_shape=jax.ShapeDtypeStruct((B_pad, output_dim), jnp.float32),
        grid_spec=pltpu.PrefetchScalarGridSpec(
            num_scalar_prefetch=0,
            grid=(n_tiles,),
            in_specs=in_specs,
            out_specs=out_spec,
        ),
        compiler_params=pltpu.CompilerParams(
            dimension_semantics=("parallel",),
            vmem_limit_bytes=vmem_limit),
        cost_estimate=pl.CostEstimate(
            flops=flops,
            transcendentals=transcendentals,
            bytes_accessed=bytes_accessed),
    )(x_in, *flat_params)

    return out[:B]   # batch slice only; feature dim is already exact


def init_params(key, input_dim, output_dim, hidden_dim):
    """Weights stored as (in, out), i.e. x @ W + b == PyTorch x @ W.T + b."""
    dims = [(input_dim, hidden_dim)] + [(hidden_dim, hidden_dim)] * 5 + \
           [(hidden_dim, output_dim)]
    params = []
    for (fan_in, fan_out) in dims:
        key, kw, kb = jax.random.split(key, 3)
        bound = 1.0 / jnp.sqrt(fan_in)
        w = jax.random.uniform(kw, (fan_in, fan_out), jnp.float32, -bound, bound)
        b = jax.random.uniform(kb, (1, fan_out), jnp.float32, -bound, bound)
        params.append((w, b))
    return params


def reference_forward(x, params):
    h = x
    for w, b in params[:-1]:
        h = jnp.tanh(h @ w + b)
    w, b = params[-1]
    return jax.nn.log_softmax(h @ w + b, axis=1)


if __name__ == "__main__":
    key = jax.random.PRNGKey(0)
    input_dim, hidden_dim, output_dim = 16, 32, 10
    key, kp = jax.random.split(key)
    params = init_params(kp, input_dim, output_dim, hidden_dim)

    # Case 1: tiny batch, f32 MXU + f32 tanh -> tight structural check.
    B1 = 8
    key, kx1 = jax.random.split(key)
    x1 = jax.random.normal(kx1, (B1, input_dim), jnp.float32)
    out1 = jax.block_until_ready(
        netsoftmax_forward(x1, params, matmul_dtype=jnp.float32,
                           activation_dtype=jnp.float32))
    ref1 = reference_forward(x1, params)
    assert out1.shape == (B1, output_dim)
    assert jnp.allclose(out1, ref1, atol=1e-4, rtol=1e-4), "f32 mismatch"

    # Case 2: multi-tile "parallel" grid, bf16 MXU operands, f32 tanh
    # (the v5e-safe configuration).
    B2 = 256
    key, kx2 = jax.random.split(key)
    x2 = jax.random.normal(kx2, (B2, input_dim), jnp.float32)
    out2 = jax.block_until_ready(
        netsoftmax_forward(x2, params, block_b=1024,
                           matmul_dtype=jnp.bfloat16,
                           activation_dtype=jnp.float32))
    ref2 = reference_forward(x2, params)
    assert out2.shape == (B2, output_dim)
    assert jnp.allclose(out2, ref2, atol=5e-2, rtol=5e-2), "bf16-mxu mismatch"

    # Case 3: awkward batch (exercises the no-2x-pad tiling path) + bf16
    # activations (the v6e/v7x configuration: bf16 EUP tanh).
    B3 = 200
    key, kx3 = jax.random.split(key)
    x3 = jax.random.normal(kx3, (B3, input_dim), jnp.float32)
    out3 = jax.block_until_ready(
        netsoftmax_forward(x3, params, block_b=1024,
                           matmul_dtype=jnp.bfloat16,
                           activation_dtype=jnp.bfloat16))
    ref3 = reference_forward(x3, params)
    assert out3.shape == (B3, output_dim)
    assert jnp.allclose(out3, ref3, atol=1e-1, rtol=1e-1), "bf16-act mismatch"

    print("KERNEL_OK")
</pallas_src>

<mosaic_0001>
module attributes {stable_mosaic.version = 11 : i64} {
  func.func @_netsoftmax_kernel(%arg0: i32, %arg1: memref<8x16xf32, #tpu.memory_space<vmem>>, %arg2: memref<16x128xf32, #tpu.memory_space<vmem>>, %arg3: memref<1x128xf32, #tpu.memory_space<vmem>>, %arg4: memref<128x128xf32, #tpu.memory_space<vmem>>, %arg5: memref<1x128xf32, #tpu.memory_space<vmem>>, %arg6: memref<128x128xf32, #tpu.memory_space<vmem>>, %arg7: memref<1x128xf32, #tpu.memory_space<vmem>>, %arg8: memref<128x128xf32, #tpu.memory_space<vmem>>, %arg9: memref<1x128xf32, #tpu.memory_space<vmem>>, %arg10: memref<128x128xf32, #tpu.memory_space<vmem>>, %arg11: memref<1x128xf32, #tpu.memory_space<vmem>>, %arg12: memref<128x128xf32, #tpu.memory_space<vmem>>, %arg13: memref<1x128xf32, #tpu.memory_space<vmem>>, %arg14: memref<128x128xf32, #tpu.memory_space<vmem>>, %arg15: memref<1x128xf32, #tpu.memory_space<vmem>>, %arg16: memref<8x10xf32, #tpu.memory_space<vmem>>) attributes {dimension_semantics = [#tpu.dimension_semantics<parallel>], iteration_bounds = array<i64: 1>, scalar_prefetch = 0 : i64, scratch_operands = 0 : i64, tpu.core_type = #tpu.core_type<tc>, window_params = [{transform_indices = @transform_0, window_bounds = array<i64: 8, 16>}, {pipeline_mode = #tpu.pipeline_mode<synchronous>, transform_indices = @transform_1, window_bounds = array<i64: 16, 128>}, {pipeline_mode = #tpu.pipeline_mode<synchronous>, transform_indices = @transform_2, window_bounds = array<i64: 1, 128>}, {pipeline_mode = #tpu.pipeline_mode<synchronous>, transform_indices = @transform_3, window_bounds = array<i64: 128, 128>}, {pipeline_mode = #tpu.pipeline_mode<synchronous>, transform_indices = @transform_4, window_bounds = array<i64: 1, 128>}, {pipeline_mode = #tpu.pipeline_mode<synchronous>, transform_indices = @transform_5, window_bounds = array<i64: 128, 128>}, {pipeline_mode = #tpu.pipeline_mode<synchronous>, transform_indices = @transform_6, window_bounds = array<i64: 1, 128>}, {pipeline_mode = #tpu.pipeline_mode<synchronous>, transform_indices = @transform_7, window_bounds = array<i64: 128, 128>}, {pipeline_mode = #tpu.pipeline_mode<synchronous>, transform_indices = @transform_8, window_bounds = array<i64: 1, 128>}, {pipeline_mode = #tpu.pipeline_mode<synchronous>, transform_indices = @transform_9, window_bounds = array<i64: 128, 128>}, {pipeline_mode = #tpu.pipeline_mode<synchronous>, transform_indices = @transform_10, window_bounds = array<i64: 1, 128>}, {pipeline_mode = #tpu.pipeline_mode<synchronous>, transform_indices = @transform_11, window_bounds = array<i64: 128, 128>}, {pipeline_mode = #tpu.pipeline_mode<synchronous>, transform_indices = @transform_12, window_bounds = array<i64: 1, 128>}, {pipeline_mode = #tpu.pipeline_mode<synchronous>, transform_indices = @transform_13, window_bounds = array<i64: 128, 128>}, {pipeline_mode = #tpu.pipeline_mode<synchronous>, transform_indices = @transform_14, window_bounds = array<i64: 1, 128>}, {transform_indices = @transform_15, window_bounds = array<i64: 8, 10>}]} {
    %c0 = arith.constant 0 : index
    %c0_0 = arith.constant 0 : index
    %0 = vector.load %arg1[%c0, %c0_0] : memref<8x16xf32, #tpu.memory_space<vmem>>, vector<8x16xf32>
    %c0_1 = arith.constant 0 : index
    %c0_2 = arith.constant 0 : index
    %1 = vector.load %arg2[%c0_1, %c0_2] : memref<16x128xf32, #tpu.memory_space<vmem>>, vector<16x128xf32>
    %cst = arith.constant dense<0.000000e+00> : vector<8x128xf32>
    %2 = tpu.matmul %0, %1, %cst {dimension_numbers = #tpu.dot_dimension_numbers<[1], [0], [0], [1], [0, 0, 1, 1], [], []>} : vector<8x16xf32>, vector<16x128xf32>, vector<8x128xf32> -> vector<8x128xf32>
    %c0_3 = arith.constant 0 : index
    %c0_4 = arith.constant 0 : index
    %3 = vector.load %arg3[%c0_3, %c0_4] : memref<1x128xf32, #tpu.memory_space<vmem>>, vector<1x128xf32>
    %4 = vector.broadcast %3 : vector<1x128xf32> to vector<8x128xf32>
    %5 = arith.addf %2, %4 : vector<8x128xf32>
    %6 = math.tanh %5 : vector<8x128xf32>
    %c0_5 = arith.constant 0 : index
    %c0_6 = arith.constant 0 : index
    %7 = vector.load %arg4[%c0_5, %c0_6] : memref<128x128xf32, #tpu.memory_space<vmem>>, vector<128x128xf32>
    %cst_7 = arith.constant dense<0.000000e+00> : vector<8x128xf32>
    %8 = tpu.matmul %6, %7, %cst_7 {dimension_numbers = #tpu.dot_dimension_numbers<[1], [0], [0], [1], [0, 0, 1, 1], [], []>} : vector<8x128xf32>, vector<128x128xf32>, vector<8x128xf32> -> vector<8x128xf32>
    %c0_8 = arith.constant 0 : index
    %c0_9 = arith.constant 0 : index
    %9 = vector.load %arg5[%c0_8, %c0_9] : memref<1x128xf32, #tpu.memory_space<vmem>>, vector<1x128xf32>
    %10 = vector.broadcast %9 : vector<1x128xf32> to vector<8x128xf32>
    %11 = arith.addf %8, %10 : vector<8x128xf32>
    %12 = math.tanh %11 : vector<8x128xf32>
    %c0_10 = arith.constant 0 : index
    %c0_11 = arith.constant 0 : index
    %13 = vector.load %arg6[%c0_10, %c0_11] : memref<128x128xf32, #tpu.memory_space<vmem>>, vector<128x128xf32>
    %cst_12 = arith.constant dense<0.000000e+00> : vector<8x128xf32>
    %14 = tpu.matmul %12, %13, %cst_12 {dimension_numbers = #tpu.dot_dimension_numbers<[1], [0], [0], [1], [0, 0, 1, 1], [], []>} : vector<8x128xf32>, vector<128x128xf32>, vector<8x128xf32> -> vector<8x128xf32>
    %c0_13 = arith.constant 0 : index
    %c0_14 = arith.constant 0 : index
    %15 = vector.load %arg7[%c0_13, %c0_14] : memref<1x128xf32, #tpu.memory_space<vmem>>, vector<1x128xf32>
    %16 = vector.broadcast %15 : vector<1x128xf32> to vector<8x128xf32>
    %17 = arith.addf %14, %16 : vector<8x128xf32>
    %18 = math.tanh %17 : vector<8x128xf32>
    %c0_15 = arith.constant 0 : index
    %c0_16 = arith.constant 0 : index
    %19 = vector.load %arg8[%c0_15, %c0_16] : memref<128x128xf32, #tpu.memory_space<vmem>>, vector<128x128xf32>
    %cst_17 = arith.constant dense<0.000000e+00> : vector<8x128xf32>
    %20 = tpu.matmul %18, %19, %cst_17 {dimension_numbers = #tpu.dot_dimension_numbers<[1], [0], [0], [1], [0, 0, 1, 1], [], []>} : vector<8x128xf32>, vector<128x128xf32>, vector<8x128xf32> -> vector<8x128xf32>
    %c0_18 = arith.constant 0 : index
    %c0_19 = arith.constant 0 : index
    %21 = vector.load %arg9[%c0_18, %c0_19] : memref<1x128xf32, #tpu.memory_space<vmem>>, vector<1x128xf32>
    %22 = vector.broadcast %21 : vector<1x128xf32> to vector<8x128xf32>
    %23 = arith.addf %20, %22 : vector<8x128xf32>
    %24 = math.tanh %23 : vector<8x128xf32>
    %c0_20 = arith.constant 0 : index
    %c0_21 = arith.constant 0 : index
    %25 = vector.load %arg10[%c0_20, %c0_21] : memref<128x128xf32, #tpu.memory_space<vmem>>, vector<128x128xf32>
    %cst_22 = arith.constant dense<0.000000e+00> : vector<8x128xf32>
    %26 = tpu.matmul %24, %25, %cst_22 {dimension_numbers = #tpu.dot_dimension_numbers<[1], [0], [0], [1], [0, 0, 1, 1], [], []>} : vector<8x128xf32>, vector<128x128xf32>, vector<8x128xf32> -> vector<8x128xf32>
    %c0_23 = arith.constant 0 : index
    %c0_24 = arith.constant 0 : index
    %27 = vector.load %arg11[%c0_23, %c0_24] : memref<1x128xf32, #tpu.memory_space<vmem>>, vector<1x128xf32>
    %28 = vector.broadcast %27 : vector<1x128xf32> to vector<8x128xf32>
    %29 = arith.addf %26, %28 : vector<8x128xf32>
    %30 = math.tanh %29 : vector<8x128xf32>
    %c0_25 = arith.constant 0 : index
    %c0_26 = arith.constant 0 : index
    %31 = vector.load %arg12[%c0_25, %c0_26] : memref<128x128xf32, #tpu.memory_space<vmem>>, vector<128x128xf32>
    %cst_27 = arith.constant dense<0.000000e+00> : vector<8x128xf32>
    %32 = tpu.matmul %30, %31, %cst_27 {dimension_numbers = #tpu.dot_dimension_numbers<[1], [0], [0], [1], [0, 0, 1, 1], [], []>} : vector<8x128xf32>, vector<128x128xf32>, vector<8x128xf32> -> vector<8x128xf32>
    %c0_28 = arith.constant 0 : index
    %c0_29 = arith.constant 0 : index
    %33 = vector.load %arg13[%c0_28, %c0_29] : memref<1x128xf32, #tpu.memory_space<vmem>>, vector<1x128xf32>
    %34 = vector.broadcast %33 : vector<1x128xf32> to vector<8x128xf32>
    %35 = arith.addf %32, %34 : vector<8x128xf32>
    %36 = math.tanh %35 : vector<8x128xf32>
    %c0_30 = arith.constant 0 : index
    %c0_31 = arith.constant 0 : index
    %37 = vector.load %arg14[%c0_30, %c0_31] : memref<128x128xf32, #tpu.memory_space<vmem>>, vector<128x128xf32>
    %cst_32 = arith.constant dense<0.000000e+00> : vector<8x128xf32>
    %38 = tpu.matmul %36, %37, %cst_32 {dimension_numbers = #tpu.dot_dimension_numbers<[1], [0], [0], [1], [0, 0, 1, 1], [], []>} : vector<8x128xf32>, vector<128x128xf32>, vector<8x128xf32> -> vector<8x128xf32>
    %c0_33 = arith.constant 0 : index
    %c0_34 = arith.constant 0 : index
    %39 = vector.load %arg15[%c0_33, %c0_34] : memref<1x128xf32, #tpu.memory_space<vmem>>, vector<1x128xf32>
    %40 = vector.broadcast %39 : vector<1x128xf32> to vector<8x128xf32>
    %41 = arith.addf %38, %40 : vector<8x128xf32>
    %cst_35 = arith.constant dense<0xFF800000> : vector<8xf32>
    %42 = vector.multi_reduction <maximumf>, %41, %cst_35 [1] : vector<8x128xf32> to vector<8xf32>
    %43 = vector.shape_cast %42 : vector<8xf32> to vector<8x1xf32>
    %44 = vector.broadcast %43 : vector<8x1xf32> to vector<8x128xf32>
    %45 = arith.subf %41, %44 : vector<8x128xf32>
    %46 = math.exp %45 : vector<8x128xf32>
    %cst_36 = arith.constant dense<0.000000e+00> : vector<8xf32>
    %47 = vector.multi_reduction <add>, %46, %cst_36 [1] : vector<8x128xf32> to vector<8xf32>
    %48 = vector.shape_cast %47 : vector<8xf32> to vector<8x1xf32>
    %49 = math.log %48 : vector<8x1xf32>
    %50 = vector.broadcast %49 : vector<8x1xf32> to vector<8x128xf32>
    %51 = arith.subf %45, %50 : vector<8x128xf32>
    %52 = vector.extract_strided_slice %51 {offsets = [0, 0], sizes = [8, 10], strides = [1, 1]} : vector<8x128xf32> to vector<8x10xf32>
    %c0_37 = arith.constant 0 : index
    %c0_38 = arith.constant 0 : index
    %53 = vector.load %arg16[%c0_37, %c0_38] : memref<8x10xf32, #tpu.memory_space<vmem>>, vector<8x10xf32>
    tpu.vector_store %arg16[%c0_37, %c0_38], %52 {strides = array<i32>} : memref<8x10xf32, #tpu.memory_space<vmem>>, vector<8x10xf32>,
    return
  }
  func.func @transform_0(%arg0: i32) -> (i32, i32) {
    %c0_i32 = arith.constant 0 : i32
    %c0_i32_0 = arith.constant 0 : i32
    return %arg0, %c0_i32 : i32, i32
  }
  func.func @transform_1(%arg0: i32) -> (i32, i32) {
    %c0_i32 = arith.constant 0 : i32
    %c0_i32_0 = arith.constant 0 : i32
    %c0_i32_1 = arith.constant 0 : i32
    return %c0_i32, %c0_i32_0 : i32, i32
  }
  func.func @transform_2(%arg0: i32) -> (i32, i32) {
    %c0_i32 = arith.constant 0 : i32
    %c0_i32_0 = arith.constant 0 : i32
    %c0_i32_1 = arith.constant 0 : i32
    return %c0_i32, %c0_i32_0 : i32, i32
  }
  func.func @transform_3(%arg0: i32) -> (i32, i32) {
    %c0_i32 = arith.constant 0 : i32
    %c0_i32_0 = arith.constant 0 : i32
    %c0_i32_1 = arith.constant 0 : i32
    return %c0_i32, %c0_i32_0 : i32, i32
  }
  func.func @transform_4(%arg0: i32) -> (i32, i32) {
    %c0_i32 = arith.constant 0 : i32
    %c0_i32_0 = arith.constant 0 : i32
    %c0_i32_1 = arith.constant 0 : i32
    return %c0_i32, %c0_i32_0 : i32, i32
  }
  func.func @transform_5(%arg0: i32) -> (i32, i32) {
    %c0_i32 = arith.constant 0 : i32
    %c0_i32_0 = arith.constant 0 : i32
    %c0_i32_1 = arith.constant 0 : i32
    return %c0_i32, %c0_i32_0 : i32, i32
  }
  func.func @transform_6(%arg0: i32) -> (i32, i32) {
    %c0_i32 = arith.constant 0 : i32
    %c0_i32_0 = arith.constant 0 : i32
    %c0_i32_1 = arith.constant 0 : i32
    return %c0_i32, %c0_i32_0 : i32, i32
  }
  func.func @transform_7(%arg0: i32) -> (i32, i32) {
    %c0_i32 = arith.constant 0 : i32
    %c0_i32_0 = arith.constant 0 : i32
    %c0_i32_1 = arith.constant 0 : i32
    return %c0_i32, %c0_i32_0 : i32, i32
  }
  func.func @transform_8(%arg0: i32) -> (i32, i32) {
    %c0_i32 = arith.constant 0 : i32
    %c0_i32_0 = arith.constant 0 : i32
    %c0_i32_1 = arith.constant 0 : i32
    return %c0_i32, %c0_i32_0 : i32, i32
  }
  func.func @transform_9(%arg0: i32) -> (i32, i32) {
    %c0_i32 = arith.constant 0 : i32
    %c0_i32_0 = arith.constant 0 : i32
    %c0_i32_1 = arith.constant 0 : i32
    return %c0_i32, %c0_i32_0 : i32, i32
  }
  func.func @transform_10(%arg0: i32) -> (i32, i32) {
    %c0_i32 = arith.constant 0 : i32
    %c0_i32_0 = arith.constant 0 : i32
    %c0_i32_1 = arith.constant 0 : i32
    return %c0_i32, %c0_i32_0 : i32, i32
  }
  func.func @transform_11(%arg0: i32) -> (i32, i32) {
    %c0_i32 = arith.constant 0 : i32
    %c0_i32_0 = arith.constant 0 : i32
    %c0_i32_1 = arith.constant 0 : i32
    return %c0_i32, %c0_i32_0 : i32, i32
  }
  func.func @transform_12(%arg0: i32) -> (i32, i32) {
    %c0_i32 = arith.constant 0 : i32
    %c0_i32_0 = arith.constant 0 : i32
    %c0_i32_1 = arith.constant 0 : i32
    return %c0_i32, %c0_i32_0 : i32, i32
  }
  func.func @transform_13(%arg0: i32) -> (i32, i32) {
    %c0_i32 = arith.constant 0 : i32
    %c0_i32_0 = arith.constant 0 : i32
    %c0_i32_1 = arith.constant 0 : i32
    return %c0_i32, %c0_i32_0 : i32, i32
  }
  func.func @transform_14(%arg0: i32) -> (i32, i32) {
    %c0_i32 = arith.constant 0 : i32
    %c0_i32_0 = arith.constant 0 : i32
    %c0_i32_1 = arith.constant 0 : i32
    return %c0_i32, %c0_i32_0 : i32, i32
  }
  func.func @transform_15(%arg0: i32) -> (i32, i32) {
    %c0_i32 = arith.constant 0 : i32
    %c0_i32_0 = arith.constant 0 : i32
    return %arg0, %c0_i32 : i32, i32
  }
}

</mosaic_0001>

<bundles_post_ra>
// kernel: tpu_custom_call.1
= control target key start
LH: loop header
LB: loop body
LE: loop exit
PB: predicated region body
PF: predicated region fallthrough
CT: control target
= control target key end

     0   :  { %20 = vsyncpa [#allocation3], 0  ;;  %s1662_s0 = inlined_call_operand.hbm [shape: f32[8,16], index: 0, kind: input, shape index: {}]   ;;  %s1663_s1 = inlined_call_operand.hbm [shape: f32[16,128], index: 1, kind: input, shape index: {}]   ;;  %s1664_s2 = inlined_call_operand.vmem [shape: f32[1,128], index: 2, kind: input, shape index: {}]   ;;  %s1665_s3 = inlined_call_operand.hbm [shape: f32[128,128], index: 3, kind: input, shape index: {}]   ;;  %s1666_s4 = inlined_call_operand.vmem [shape: f32[1,128], index: 4, kind: input, shape index: {}]   ;;  %s1667_s5 = inlined_call_operand.hbm [shape: f32[128,128], index: 5, kind: input, shape index: {}]   ;;  %s1668_s6 = inlined_call_operand.vmem [shape: f32[1,128], index: 6, kind: input, shape index: {}]   ;;  %s1669_s7 = inlined_call_operand.hbm [shape: f32[128,128], index: 7, kind: input, shape index: {}]   ;;  %s1670_s8 = inlined_call_operand.vmem [shape: f32[1,128], index: 8, kind: input, shape index: {}]   ;;  %s1671_s9 = inlined_call_operand.hbm [shape: f32[128,128], index: 9, kind: input, shape index: {}]   ;;  %s1672_s10 = inlined_call_operand.vmem [shape: f32[1,128], index: 10, kind: input, shape index: {}]   ;;  %s1673_s11 = inlined_call_operand.hbm [shape: f32[128,128], index: 11, kind: input, shape index: {}]   ;;  %s1674_s12 = inlined_call_operand.vmem [shape: f32[1,128], index: 12, kind: input, shape index: {}]   ;;  %s1675_s13 = inlined_call_operand.hbm [shape: f32[128,128], index: 13, kind: input, shape index: {}]   ;;  %s1676_s14 = inlined_call_operand.vmem [shape: f32[1,128], index: 14, kind: input, shape index: {}]   ;;  %s1677_s15 = inlined_call_operand.hbm [shape: f32[8,10], index: 15, kind: output, shape index: {}]  }
   0x1   :  { %21 = vsyncpa [#allocation6], 0 }
   0x2   :  { %22 = vsyncpa [#allocation9], 0 }
   0x3   :  { %23 = vsyncpa [#allocation12], 0 }
   0x4   :  { %24 = vsyncpa [#allocation15], 0 }
   0x5   :  { %25 = vsyncpa [#allocation4], 0  ;;  %s1388_s18 = smov [#allocation5]  }
   0x6   :  { %s41_s19 = sshll.u32 %s1388_s18, 4  ;;  %s42_s19 = int_to_ptr.vmem [resolvable:$true] %s41_s19 }
   0x7   :  { %s1204_s20 = scalar_lea.vmem %s42_s19, 256  ;;  %p1209_p1 = scmp.lt.s32.totalorder %s42_s19, %s42_s19 }
   0x8   :  { %p1205_p0 = scmp.ne.s32.totalorder %s42_s19, %s1204_s20  ;;  %p1210_p2 = scmp.lt.s32.totalorder %s1204_s20, %s1204_s20 }
   0xa   :  { %p1211_p3 = por %p1210_p2, %p1209_p1 }
   0xc   :  { %p1212_p4 = pnand %p1211_p3, %p1205_p0 }
   0xe   :  { %1215 = shalt.err (!%p1212_p4)
}
   0xf   :  { %s1389_s21 = smov 128   ;;  %s1390_s22 = smov 8  }
  0x10   :  { %47 = dma.hbm_to_vmem [thread:$0]  %s1663_s1, 256, %s42_s19, [#allocation6], %s1389_s21, %s1389_s21, %s1390_s22  }
  0x11   :  { %s1391_s25 = smov [#allocation8]   ;;  %s1392_s27 = smov [#allocation11]  }
  0x12   :  { %s69_s26 = sshll.u32 %s1391_s25, 4  ;;  %s97_s28 = sshll.u32 %s1392_s27, 4  ;;  %s70_s26 = int_to_ptr.vmem [resolvable:$true] %s69_s26  ;;  %s98_s28 = int_to_ptr.vmem [resolvable:$true] %s97_s28 }
  0x13   :  { %s1224_s29 = scalar_lea.vmem %s70_s26, 2048  ;;  %p1229_p6 = scmp.lt.s32.totalorder %s70_s26, %s70_s26 }
  0x14   :  { %p1225_p5 = scmp.ne.s32.totalorder %s70_s26, %s1224_s29  ;;  %p1230_p7 = scmp.lt.s32.totalorder %s1224_s29, %s1224_s29 }
  0x16   :  { %p1231_p8 = por %p1230_p7, %p1229_p6 }
  0x18   :  { %p1232_p9 = pnand %p1231_p8, %p1225_p5 }
  0x1a   :  { %1235 = shalt.err (!%p1232_p9)
}
  0x1b   :  { %75 = dma.hbm_to_vmem [thread:$0]  %s1667_s5, 2048, %s70_s26, [#allocation9], %s1389_s21, %s1389_s21, %s1390_s22  }
  0x1c   :  { %s1244_s1 = scalar_lea.vmem %s98_s28, 2048  ;;  %p1249_p11 = scmp.lt.s32.totalorder %s98_s28, %s98_s28 }
  0x1d   :  { %p1245_p10 = scmp.ne.s32.totalorder %s98_s28, %s1244_s1  ;;  %p1250_p12 = scmp.lt.s32.totalorder %s1244_s1, %s1244_s1 }
  0x1f   :  { %p1251_p13 = por %p1250_p12, %p1249_p11 }
  0x21   :  { %p1252_p0 = pnand %p1251_p13, %p1245_p10 }
  0x23   :  { %1255 = shalt.err (!%p1252_p0)
}
  0x24   :  { %103 = dma.hbm_to_vmem [thread:$0]  %s1671_s9, 2048, %s98_s28, [#allocation12], %s1389_s21, %s1389_s21, %s1390_s22  }
  0x25   :  { %s1393_s19 = smov [#allocation2]   ;;  %s1394_s23 = smov [#allocation7]  }
  0x26   :  { %s32_s20 = sshll.u32 %s1393_s19, 4  ;;  %s55_s5 = sshll.u32 %s1394_s23, 4  ;;  %s33_s20 = int_to_ptr.vmem [resolvable:$true] %s32_s20  ;;  %s56_s5 = int_to_ptr.vmem [resolvable:$true] %s55_s5 }
  0x27   :  { %s1264_s24 = scalar_lea.vmem %s33_s20, 128  ;;  %p1269_p2 = scmp.lt.s32.totalorder %s33_s20, %s33_s20 }
  0x28   :  { %p1265_p1 = scmp.ne.s32.totalorder %s33_s20, %s1264_s24  ;;  %p1270_p3 = scmp.lt.s32.totalorder %s1264_s24, %s1264_s24 }
  0x2a   :  { %p1271_p4 = por %p1270_p3, %p1269_p2 }
  0x2c   :  { %p1272_p5 = pnand %p1271_p4, %p1265_p1 }
  0x2e   :  { %1275 = shalt.err (!%p1272_p5)
}
  0x2f   :  { %35 = dma.hbm_to_vmem [thread:$0]  %s1662_s0, 128, %s33_s20, [#allocation3]  }
  0x30   :  { %s1284_s27 = scalar_lea.vmem %s56_s5, 2048  ;;  %p1289_p7 = scmp.lt.s32.totalorder %s56_s5, %s56_s5 }
  0x31   :  { %p1285_p6 = scmp.ne.s32.totalorder %s56_s5, %s1284_s27  ;;  %p1290_p8 = scmp.lt.s32.totalorder %s1284_s27, %s1284_s27 }
  0x33   :  { %p1291_p9 = por %p1290_p8, %p1289_p7 }
  0x35   :  { %p1292_p10 = pnand %p1291_p9, %p1285_p6 }
  0x37   :  { %1295 = shalt.err (!%p1292_p10)
}
  0x38   :  { %61 = dma.hbm_to_vmem [thread:$0]  %s1665_s3, 2048, %s56_s5, [#allocation6], %s1389_s21, %s1389_s21, %s1390_s22  }
  0x39   :  { %s1395_s29 = smov [#allocation10]   ;;  %s1396_s16 = smov [#allocation13]  }
  0x3a   :  { %s83_s30 = sshll.u32 %s1395_s29, 4  ;;  %s111_s0 = sshll.u32 %s1396_s16, 4  ;;  %s84_s30 = int_to_ptr.vmem [resolvable:$true] %s83_s30  ;;  %s112_s0 = int_to_ptr.vmem [resolvable:$true] %s111_s0 }
  0x3b   :  { %s1304_s1 = scalar_lea.vmem %s84_s30, 2048  ;;  %p1309_p12 = scmp.lt.s32.totalorder %s84_s30, %s84_s30 }
  0x3c   :  { %p1305_p11 = scmp.ne.s32.totalorder %s84_s30, %s1304_s1  ;;  %p1310_p13 = scmp.lt.s32.totalorder %s1304_s1, %s1304_s1 }
  0x3e   :  { %p1311_p0 = por %p1310_p13, %p1309_p12 }
  0x40   :  { %p1312_p1 = pnand %p1311_p0, %p1305_p11 }
  0x42   :  { %1315 = shalt.err (!%p1312_p1)
}
  0x43   :  { %89 = dma.hbm_to_vmem [thread:$0]  %s1669_s7, 2048, %s84_s30, [#allocation9], %s1389_s21, %s1389_s21, %s1390_s22  }
  0x44   :  { %s1324_s3 = scalar_lea.vmem %s112_s0, 2048  ;;  %p1329_p3 = scmp.lt.s32.totalorder %s112_s0, %s112_s0 }
  0x45   :  { %p1325_p2 = scmp.ne.s32.totalorder %s112_s0, %s1324_s3  ;;  %p1330_p4 = scmp.lt.s32.totalorder %s1324_s3, %s1324_s3 }
  0x47   :  { %p1331_p5 = por %p1330_p4, %p1329_p3 }
  0x49   :  { %p1332_p6 = pnand %p1331_p5, %p1325_p2 }
  0x4b   :  { %1335 = shalt.err (!%p1332_p6)
}
  0x4c   :  { %117 = dma.hbm_to_vmem [thread:$0]  %s1673_s11, 2048, %s112_s0, [#allocation12], %s1389_s21, %s1389_s21, %s1390_s22  }
  0x4d   :  { %s1397_s23 = smov [#allocation14]  }
  0x4e   :  { %s125_s5 = sshll.u32 %s1397_s23, 4  ;;  %s126_s5 = int_to_ptr.vmem [resolvable:$true] %s125_s5 }
  0x4f   :  { %s1344_s24 = scalar_lea.vmem %s126_s5, 2048  ;;  %p1349_p8 = scmp.lt.s32.totalorder %s126_s5, %s126_s5 }
  0x50   :  { %p1345_p7 = scmp.ne.s32.totalorder %s126_s5, %s1344_s24  ;;  %p1350_p9 = scmp.lt.s32.totalorder %s1344_s24, %s1344_s24 }
  0x52   :  { %p1351_p10 = por %p1350_p9, %p1349_p8 }
  0x54   :  { %p1352_p11 = pnand %p1351_p10, %p1345_p7 }
  0x56   :  { %1355 = shalt.err (!%p1352_p11)
}
  0x57   :  { %131 = dma.hbm_to_vmem [thread:$0]  %s1675_s13, 2048, %s126_s5, [#allocation15], %s1389_s21, %s1389_s21, %s1390_s22  }
  0x58   :  { %1376 = dma.done.wait [#allocation3], 128  }
  0x59   :  { %1377 = vsyncadd [#allocation3], 4294967168 }
  0x5a   :  { %1378 = dma.done.wait [#allocation6], 2304  }
  0x5b   :  { %1379 = vsyncadd [#allocation6], 4294964992 }
  0x5c   :  { %1380 = dma.done.wait [#allocation9], 4096  }
  0x5d   :  { %1381 = vsyncadd [#allocation9], 4294963200 }
  0x5e   :  { %1382 = dma.done.wait [#allocation12], 4096  }
  0x5f   :  { %1383 = vsyncadd [#allocation12], 4294963200 }
  0x60   :  { %1384 = dma.done.wait [#allocation15], 2048  }
  0x61   :  { %1385 = vsyncadd [#allocation15], 4294965248  ;;  %v1398_v0 = vmov 0.0   ;;  %vm1399_vm0 = vmmov 0   ;;  %v160_v1 = vld [vmem:[#allocation5 + $0x8] sm:$0xff]  ;;  %v159_v2 = vld [vmem:[#allocation5] sm:$0xff] }
  0x62   :  { %950 = vmatprep.subr.mxu0 %v1398_v0  ;;  %954 = vmatprep.mubr.msk.f32.mxu0 %vm1399_vm0, %v1398_v0  ;;  %v158_v3 = vld [vmem:[#allocation2] sm:$0xff]  ;;  %vm168_vm1 = vcmask 130048   ;;  %v258_v4 = vld [vmem:[#allocation7 + $0x78] sm:$0xff]  ;;  %v257_v5 = vld [vmem:[#allocation7 + $0x70] sm:$0xff]  ;;  %vm816_vm2 = vcmask 80896  }
  0x63   :  { %957 = vmatprep.subr.mxu1 %v1398_v0  ;;  %989 = vmatprep.mubr.msk.f32.mxu1 %vm1399_vm0, %v1398_v0  ;;  %v256_v6 = vld [vmem:[#allocation7 + $0x68] sm:$0xff]  ;;  %v255_v7 = vld [vmem:[#allocation7 + $0x60] sm:$0xff]  ;;  %v254_v8 = vld [vmem:[#allocation7 + $0x58] sm:$0xff] }
  0x64   :  { %951 = vmatpush3.msra.mxu0 %v160_v1  ;;  %958 = vmatpush3.msra.mxu1 %v258_v4  ;;  %v253_v9 = vld [vmem:[#allocation7 + $0x50] sm:$0xff]  ;;  %v252_v10 = vld [vmem:[#allocation7 + $0x48] sm:$0xff]  ;;  %v251_v11 = vld [vmem:[#allocation7 + $0x40] sm:$0xff] }
  0x65   :  { %952 = vmatprep.subr.mxu0 %v1398_v0  ;;  %959 = vmatprep.subr.mxu1 %v1398_v0  ;;  %v250_v12 = vld [vmem:[#allocation7 + $0x38] sm:$0xff]  ;;  %v249_v13 = vld [vmem:[#allocation7 + $0x30] sm:$0xff]  ;;  %v248_v14 = vld [vmem:[#allocation7 + $0x28] sm:$0xff] }
  0x66   :  { %953 = vmatpush3.msra.mxu0 %v159_v2  ;;  %960 = vmatpush3.msra.mxu1 %v257_v5  ;;  %v247_v15 = vld [vmem:[#allocation7 + $0x20] sm:$0xff]  ;;  %v246_v16 = vld [vmem:[#allocation7 + $0x18] sm:$0xff]  ;;  %v245_v17 = vld [vmem:[#allocation7 + $0x10] sm:$0xff] }
  0x67   :  { %955 = vmatmul.mubr.msk.f32.vlgmr.msra.gmra.mxu0 %vm168_vm1, %v158_v3  ;;  %961 = vmatprep.subr.mxu1 %v1398_v0  ;;  %v244_v18 = vld [vmem:[#allocation7 + $0x8] sm:$0xff]  ;;  %v243_v19 = vld [vmem:[#allocation7] sm:$0xff]  ;;  %v352_v20 = vld [vmem:[#allocation8 + $0x78] sm:$0xff] }
  0x68   :  { %992 = vmatprep.subr.mxu0 %v1398_v0  ;;  %962 = vmatpush3.msra.mxu1 %v256_v6  ;;  %v351_v21 = vld [vmem:[#allocation8 + $0x70] sm:$0xff]  ;;  %v350_v22 = vld [vmem:[#allocation8 + $0x68] sm:$0xff]  ;;  %v349_v23 = vld [vmem:[#allocation8 + $0x60] sm:$0xff] }
  0x69   :  { %1024 = vmatprep.mubr.msk.f32.mxu0 %vm1399_vm0, %v1398_v0  ;;  %963 = vmatprep.subr.mxu1 %v1398_v0  ;;  %v348_v24 = vld [vmem:[#allocation8 + $0x58] sm:$0xff]  ;;  %v347_v25 = vld [vmem:[#allocation8 + $0x50] sm:$0xff]  ;;  %v346_v26 = vld [vmem:[#allocation8 + $0x48] sm:$0xff] }
  0x6a   :  { %964 = vmatpush3.msra.mxu1 %v255_v7  ;;  %993 = vmatpush3.msra.mxu0 %v352_v20  ;;  %v837_v27 = vld [vmem:[%s1664_s2] ss:$0 sm:$0xff]  ;;  %v345_v32 = vld [vmem:[#allocation8 + $0x40] sm:$0xff]  ;;  %v344_v33 = vld [vmem:[#allocation8 + $0x38] sm:$0xff] }
  0x6b   :  { %965 = vmatprep.subr.mxu1 %v1398_v0  ;;  %994 = vmatprep.subr.mxu0 %v1398_v0  ;;  %v343_v34 = vld [vmem:[#allocation8 + $0x30] sm:$0xff]  ;;  %v342_v35 = vld [vmem:[#allocation8 + $0x28] sm:$0xff]  ;;  %v341_v36 = vld [vmem:[#allocation8 + $0x20] sm:$0xff] }
  0x6c   :  { %966 = vmatpush3.msra.mxu1 %v254_v8  ;;  %995 = vmatpush3.msra.mxu0 %v351_v21  ;;  %v340_v37 = vld [vmem:[#allocation8 + $0x18] sm:$0xff]  ;;  %v339_v38 = vld [vmem:[#allocation8 + $0x10] sm:$0xff]  ;;  %v338_v39 = vld [vmem:[#allocation8 + $0x8] sm:$0xff] }
  0x6d   :  { %967 = vmatprep.subr.mxu1 %v1398_v0  ;;  %996 = vmatprep.subr.mxu0 %v1398_v0  ;;  %v337_v40 = vld [vmem:[#allocation8] sm:$0xff]  ;;  %v446_v41 = vld [vmem:[#allocation10 + $0x78] sm:$0xff]  ;;  %v445_v42 = vld [vmem:[#allocation10 + $0x70] sm:$0xff] }
  0x6e   :  { %968 = vmatpush3.msra.mxu1 %v253_v9  ;;  %997 = vmatpush3.msra.mxu0 %v350_v22  ;;  %v444_v43 = vld [vmem:[#allocation10 + $0x68] sm:$0xff]  ;;  %v443_v44 = vld [vmem:[#allocation10 + $0x60] sm:$0xff]  ;;  %v442_v45 = vld [vmem:[#allocation10 + $0x58] sm:$0xff] }
  0x6f   :  { %969 = vmatprep.subr.mxu1 %v1398_v0  ;;  %998 = vmatprep.subr.mxu0 %v1398_v0  ;;  %v441_v46 = vld [vmem:[#allocation10 + $0x50] sm:$0xff]  ;;  %v440_v47 = vld [vmem:[#allocation10 + $0x48] sm:$0xff]  ;;  %v439_v53 = vld [vmem:[#allocation10 + $0x40] sm:$0xff] }
  0x70   :  { %970 = vmatpush3.msra.mxu1 %v252_v10  ;;  %999 = vmatpush3.msra.mxu0 %v349_v23  ;;  %v839_v48 = vld [vmem:[%s1666_s4] ss:$0 sm:$0xff]  ;;  %v438_v54 = vld [vmem:[#allocation10 + $0x38] sm:$0xff]  ;;  %v437_v55 = vld [vmem:[#allocation10 + $0x30] sm:$0xff] }
  0x71   :  { %971 = vmatprep.subr.mxu1 %v1398_v0  ;;  %1000 = vmatprep.subr.mxu0 %v1398_v0  ;;  %v436_v56 = vld [vmem:[#allocation10 + $0x28] sm:$0xff]  ;;  %v435_v57 = vld [vmem:[#allocation10 + $0x20] sm:$0xff]  ;;  %v434_v58 = vld [vmem:[#allocation10 + $0x18] sm:$0xff] }
  0x72   :  { %972 = vmatpush3.msra.mxu1 %v251_v11  ;;  %1001 = vmatpush3.msra.mxu0 %v348_v24  ;;  %v433_v59 = vld [vmem:[#allocation10 + $0x10] sm:$0xff]  ;;  %v432_v60 = vld [vmem:[#allocation10 + $0x8] sm:$0xff]  ;;  %v431_v61 = vld [vmem:[#allocation10] sm:$0xff] }
  0x73   :  { %973 = vmatprep.subr.mxu1 %v1398_v0  ;;  %1002 = vmatprep.subr.mxu0 %v1398_v0  ;;  %v540_v62 = vld [vmem:[#allocation11 + $0x78] sm:$0xff]  ;;  %v539_v63 = vld [vmem:[#allocation11 + $0x70] sm:$0xff]  ;;  %v538_v1 = vld [vmem:[#allocation11 + $0x68] sm:$0xff] }
  0x74   :  { %974 = vmatpush3.msra.mxu1 %v250_v12  ;;  %1003 = vmatpush3.msra.mxu0 %v347_v25  ;;  %v537_v2 = vld [vmem:[#allocation11 + $0x60] sm:$0xff]  ;;  %v536_v3 = vld [vmem:[#allocation11 + $0x58] sm:$0xff]  ;;  %v535_v4 = vld [vmem:[#allocation11 + $0x50] sm:$0xff] }
  0x75   :  { %975 = vmatprep.subr.mxu1 %v1398_v0  ;;  %1004 = vmatprep.subr.mxu0 %v1398_v0  ;;  %v534_v5 = vld [vmem:[#allocation11 + $0x48] sm:$0xff]  ;;  %v533_v11 = vld [vmem:[#allocation11 + $0x40] sm:$0xff]  ;;  %v532_v12 = vld [vmem:[#allocation11 + $0x38] sm:$0xff] }
  0x76   :  { %976 = vmatpush3.msra.mxu1 %v249_v13  ;;  %1005 = vmatpush3.msra.mxu0 %v346_v26  ;;  %v840_v6 = vld [vmem:[%s1668_s6] ss:$0 sm:$0xff]  ;;  %v531_v13 = vld [vmem:[#allocation11 + $0x30] sm:$0xff]  ;;  %v634_v20 = vld [vmem:[#allocation13 + $0x78] sm:$0xff] }
  0x77   :  { %977 = vmatprep.subr.mxu1 %v1398_v0  ;;  %1006 = vmatprep.subr.mxu0 %v1398_v0  ;;  %v633_v21 = vld [vmem:[#allocation13 + $0x70] sm:$0xff]  ;;  %v632_v22 = vld [vmem:[#allocation13 + $0x68] sm:$0xff]  ;;  %v631_v23 = vld [vmem:[#allocation13 + $0x60] sm:$0xff] }
  0x78   :  { %978 = vmatpush3.msra.mxu1 %v248_v14  ;;  %1007 = vmatpush3.msra.mxu0 %v345_v32  ;;  %v530_v14 = vld [vmem:[#allocation11 + $0x28] sm:$0xff]  ;;  %v630_v24 = vld [vmem:[#allocation13 + $0x58] sm:$0xff]  ;;  %v629_v25 = vld [vmem:[#allocation13 + $0x50] sm:$0xff] }
  0x79   :  { %979 = vmatprep.subr.mxu1 %v1398_v0  ;;  %1008 = vmatprep.subr.mxu0 %v1398_v0  ;;  %v628_v26 = vld [vmem:[#allocation13 + $0x48] sm:$0xff]  ;;  %v627_v32 = vld [vmem:[#allocation13 + $0x40] sm:$0xff] }
  0x7a   :  { %980 = vmatpush3.msra.mxu1 %v247_v15  ;;  %1009 = vmatpush3.msra.mxu0 %v344_v33  ;;  %v529_v15 = vld [vmem:[#allocation11 + $0x20] sm:$0xff]  ;;  %v626_v33 = vld [vmem:[#allocation13 + $0x38] sm:$0xff] }
  0x7b   :  { %981 = vmatprep.subr.mxu1 %v1398_v0  ;;  %1010 = vmatprep.subr.mxu0 %v1398_v0 }
  0x7c   :  { %982 = vmatpush3.msra.mxu1 %v246_v16  ;;  %1011 = vmatpush3.msra.mxu0 %v343_v34  ;;  %v528_v16 = vld [vmem:[#allocation11 + $0x18] sm:$0xff]  ;;  %v625_v34 = vld [vmem:[#allocation13 + $0x30] sm:$0xff] }
  0x7d   :  { %983 = vmatprep.subr.mxu1 %v1398_v0  ;;  %1012 = vmatprep.subr.mxu0 %v1398_v0 }
  0x7e   :  { %984 = vmatpush3.msra.mxu1 %v245_v17  ;;  %1013 = vmatpush3.msra.mxu0 %v342_v35  ;;  %v527_v17 = vld [vmem:[#allocation11 + $0x10] sm:$0xff]  ;;  %v624_v35 = vld [vmem:[#allocation13 + $0x28] sm:$0xff] }
  0x7f   :  { %985 = vmatprep.subr.mxu1 %v1398_v0  ;;  %1014 = vmatprep.subr.mxu0 %v1398_v0 }
  0x80   :  { %986 = vmatpush3.msra.mxu1 %v244_v18  ;;  %1015 = vmatpush3.msra.mxu0 %v341_v36  ;;  %v526_v18 = vld [vmem:[#allocation11 + $0x8] sm:$0xff]  ;;  %v623_v36 = vld [vmem:[#allocation13 + $0x20] sm:$0xff] }
  0x81   :  { %987 = vmatprep.subr.mxu1 %v1398_v0  ;;  %1016 = vmatprep.subr.mxu0 %v1398_v0 }
  0x82   :  { %988 = vmatpush3.msra.mxu1 %v243_v19  ;;  %1017 = vmatpush3.msra.mxu0 %v340_v37  ;;  %v525_v19 = vld [vmem:[#allocation11] sm:$0xff]  ;;  %v622_v37 = vld [vmem:[#allocation13 + $0x18] sm:$0xff] }
  0x83   :  { %1027 = vmatprep.subr.mxu1 %v1398_v0  ;;  %1018 = vmatprep.subr.mxu0 %v1398_v0 }
  0x84   :  { %1019 = vmatpush3.msra.mxu0 %v339_v38  ;;  %v621_v38 = vld [vmem:[#allocation13 + $0x10] sm:$0xff] }
  0x85   :  { %1020 = vmatprep.subr.mxu0 %v1398_v0 }
  0x86   :  { %1021 = vmatpush3.msra.mxu0 %v338_v39  ;;  %v620_v39 = vld [vmem:[#allocation13 + $0x8] sm:$0xff] }
  0x87   :  { %1022 = vmatprep.subr.mxu0 %v1398_v0 }
  0x88   :  { %1023 = vmatpush3.msra.mxu0 %v337_v40  ;;  %v619_v40 = vld [vmem:[#allocation13] sm:$0xff] }
  0x89   :  { %1062 = vmatprep.subr.mxu0 %v1398_v0 }
 0x127   :  { %v238_v28 = vpop.f32.mrf.mxu0 }
 0x128   :  { %v239_v29 = vadd.f32 %v837_v27, %v238_v28  ;;  %v841_v27 = vld [vmem:[%s1670_s8] ss:$0 sm:$0xff] }
 0x129   :  { %v956_v30 = vpop.f32.mrf.mxu0 }
 0x12a   :  { %1180 = vtanh.f32 %v239_v29 }
 0x137   :  { %v1181_v31 = vpop.eup %1180 }
 0x138   :  { %990 = vmatmul.mubr.f32.vlgmr.msra.gmra.mxu1 %v1181_v31 }
 0x139   :  { %1059 = vmatprep.mubr.msk.f32.mxu1 %vm1399_vm0, %v1398_v0  ;;  %1028 = vmatpush3.msra.mxu1 %v446_v41  ;;  %v728_v41 = vld [vmem:[#allocation14 + $0x78] sm:$0xff] }
 0x13a   :  { %1029 = vmatprep.subr.mxu1 %v1398_v0 }
 0x13b   :  { %1030 = vmatpush3.msra.mxu1 %v445_v42  ;;  %v727_v42 = vld [vmem:[#allocation14 + $0x70] sm:$0xff] }
 0x13c   :  { %1031 = vmatprep.subr.mxu1 %v1398_v0 }
 0x13d   :  { %1032 = vmatpush3.msra.mxu1 %v444_v43  ;;  %v726_v43 = vld [vmem:[#allocation14 + $0x68] sm:$0xff] }
 0x13e   :  { %1033 = vmatprep.subr.mxu1 %v1398_v0 }
 0x13f   :  { %1034 = vmatpush3.msra.mxu1 %v443_v44  ;;  %v725_v44 = vld [vmem:[#allocation14 + $0x60] sm:$0xff] }
 0x140   :  { %1035 = vmatprep.subr.mxu1 %v1398_v0 }
 0x141   :  { %1036 = vmatpush3.msra.mxu1 %v442_v45  ;;  %v724_v45 = vld [vmem:[#allocation14 + $0x58] sm:$0xff] }
 0x142   :  { %1037 = vmatprep.subr.mxu1 %v1398_v0 }
 0x143   :  { %1038 = vmatpush3.msra.mxu1 %v441_v46  ;;  %v723_v46 = vld [vmem:[#allocation14 + $0x50] sm:$0xff] }
 0x144   :  { %1039 = vmatprep.subr.mxu1 %v1398_v0 }
 0x145   :  { %1040 = vmatpush3.msra.mxu1 %v440_v47  ;;  %v722_v47 = vld [vmem:[#allocation14 + $0x48] sm:$0xff] }
 0x146   :  { %1041 = vmatprep.subr.mxu1 %v1398_v0 }
 0x147   :  { %1042 = vmatpush3.msra.mxu1 %v439_v53  ;;  %v721_v53 = vld [vmem:[#allocation14 + $0x40] sm:$0xff] }
 0x148   :  { %1043 = vmatprep.subr.mxu1 %v1398_v0 }
 0x149   :  { %1044 = vmatpush3.msra.mxu1 %v438_v54  ;;  %v720_v54 = vld [vmem:[#allocation14 + $0x38] sm:$0xff] }
 0x14a   :  { %1045 = vmatprep.subr.mxu1 %v1398_v0 }
 0x14b   :  { %1046 = vmatpush3.msra.mxu1 %v437_v55  ;;  %v719_v55 = vld [vmem:[#allocation14 + $0x30] sm:$0xff] }
 0x14c   :  { %1047 = vmatprep.subr.mxu1 %v1398_v0 }
 0x14d   :  { %1048 = vmatpush3.msra.mxu1 %v436_v56  ;;  %v718_v56 = vld [vmem:[#allocation14 + $0x28] sm:$0xff] }
 0x14e   :  { %1049 = vmatprep.subr.mxu1 %v1398_v0 }
 0x14f   :  { %1050 = vmatpush3.msra.mxu1 %v435_v57  ;;  %v717_v57 = vld [vmem:[#allocation14 + $0x20] sm:$0xff] }
 0x150   :  { %1051 = vmatprep.subr.mxu1 %v1398_v0 }
 0x151   :  { %1052 = vmatpush3.msra.mxu1 %v434_v58  ;;  %v716_v58 = vld [vmem:[#allocation14 + $0x18] sm:$0xff] }
 0x152   :  { %1053 = vmatprep.subr.mxu1 %v1398_v0 }
 0x153   :  { %1054 = vmatpush3.msra.mxu1 %v433_v59  ;;  %v715_v59 = vld [vmem:[#allocation14 + $0x10] sm:$0xff] }
 0x154   :  { %1055 = vmatprep.subr.mxu1 %v1398_v0 }
 0x155   :  { %1056 = vmatpush3.msra.mxu1 %v432_v60  ;;  %v714_v60 = vld [vmem:[#allocation14 + $0x8] sm:$0xff] }
 0x156   :  { %1057 = vmatprep.subr.mxu1 %v1398_v0 }
 0x157   :  { %1058 = vmatpush3.msra.mxu1 %v431_v61  ;;  %v713_v61 = vld [vmem:[#allocation14] sm:$0xff] }
 0x158   :  { %1097 = vmatprep.subr.mxu1 %v1398_v0 }
 0x1f8   :  { %v332_v49 = vpop.f32.mrf.mxu1 }
 0x1f9   :  { %v333_v50 = vadd.f32 %v839_v48, %v332_v49  ;;  %v842_v48 = vld [vmem:[%s1672_s10] ss:$0 sm:$0xff] }
 0x1fa   :  { %v991_v51 = vpop.f32.mrf.mxu1 }
 0x1fb   :  { %1182 = vtanh.f32 %v333_v50 }
 0x208   :  { %v1183_v52 = vpop.eup %1182 }
 0x209   :  { %1025 = vmatmul.mubr.f32.vlgmr.msra.gmra.mxu0 %v1183_v52 }
 0x20a   :  { %1094 = vmatprep.mubr.msk.f32.mxu0 %vm1399_vm0, %v1398_v0  ;;  %1063 = vmatpush3.msra.mxu0 %v540_v62  ;;  %v843_v62 = vld [vmem:[%s1674_s12] ss:$0 sm:$0xff]  ;;  %s1400_s12 = smov [#allocation16]  }
 0x20b   :  { %1064 = vmatprep.subr.mxu0 %v1398_v0  ;;  %s824_s30 = sshll.u32 %s1400_s12, 4  ;;  %s825_s30 = int_to_ptr.vmem [resolvable:$true] %s824_s30 }
 0x20c   :  { %1065 = vmatpush3.msra.mxu0 %v539_v63  ;;  %p1361_p13 = scmp.lt.s32.totalorder %s825_s30, %s825_s30 }
 0x20d   :  { %1066 = vmatprep.subr.mxu0 %v1398_v0 }
 0x20e   :  { %1067 = vmatpush3.msra.mxu0 %v538_v1 }
 0x20f   :  { %1068 = vmatprep.subr.mxu0 %v1398_v0 }
 0x210   :  { %1069 = vmatpush3.msra.mxu0 %v537_v2 }
 0x211   :  { %1070 = vmatprep.subr.mxu0 %v1398_v0 }
 0x212   :  { %1071 = vmatpush3.msra.mxu0 %v536_v3 }
 0x213   :  { %1072 = vmatprep.subr.mxu0 %v1398_v0 }
 0x214   :  { %1073 = vmatpush3.msra.mxu0 %v535_v4  ;;  %v844_v4 = vld [vmem:[%s1676_s14] ss:$0 sm:$0xff]  ;;  %s1356_s14 = scalar_lea.vmem %s825_s30, 128 }
 0x215   :  { %1074 = vmatprep.subr.mxu0 %v1398_v0  ;;  %p1357_p12 = scmp.ne.s32.totalorder %s825_s30, %s1356_s14  ;;  %p1362_p0 = scmp.lt.s32.totalorder %s1356_s14, %s1356_s14 }
 0x216   :  { %1075 = vmatpush3.msra.mxu0 %v534_v5 }
 0x217   :  { %1076 = vmatprep.subr.mxu0 %v1398_v0  ;;  %p1363_p1 = por %p1362_p0, %p1361_p13 }
 0x218   :  { %1077 = vmatpush3.msra.mxu0 %v533_v11 }
 0x219   :  { %1078 = vmatprep.subr.mxu0 %v1398_v0  ;;  %p1364_p2 = pnand %p1363_p1, %p1357_p12 }
 0x21a   :  { %1079 = vmatpush3.msra.mxu0 %v532_v12 }
 0x21b   :  { %1080 = vmatprep.subr.mxu0 %v1398_v0 }
 0x21c   :  { %1081 = vmatpush3.msra.mxu0 %v531_v13 }
 0x21d   :  { %1082 = vmatprep.subr.mxu0 %v1398_v0 }
 0x21e   :  { %1083 = vmatpush3.msra.mxu0 %v530_v14 }
 0x21f   :  { %1084 = vmatprep.subr.mxu0 %v1398_v0 }
 0x220   :  { %1085 = vmatpush3.msra.mxu0 %v529_v15 }
 0x221   :  { %1086 = vmatprep.subr.mxu0 %v1398_v0 }
 0x222   :  { %1087 = vmatpush3.msra.mxu0 %v528_v16 }
 0x223   :  { %1088 = vmatprep.subr.mxu0 %v1398_v0 }
 0x224   :  { %1089 = vmatpush3.msra.mxu0 %v527_v17 }
 0x225   :  { %1090 = vmatprep.subr.mxu0 %v1398_v0 }
 0x226   :  { %1091 = vmatpush3.msra.mxu0 %v526_v18 }
 0x227   :  { %1092 = vmatprep.subr.mxu0 %v1398_v0 }
 0x228   :  { %1093 = vmatpush3.msra.mxu0 %v525_v19 }
 0x229   :  { %1132 = vmatprep.subr.mxu0 %v1398_v0 }
 0x2c9   :  { %v426_v7 = vpop.f32.mrf.mxu0 }
 0x2ca   :  { %v427_v8 = vadd.f32 %v840_v6, %v426_v7 }
 0x2cb   :  { %v1026_v9 = vpop.f32.mrf.mxu0 }
 0x2cc   :  { %1184 = vtanh.f32 %v427_v8 }
 0x2d9   :  { %v1185_v10 = vpop.eup %1184 }
 0x2da   :  { %1060 = vmatmul.mubr.f32.vlgmr.msra.gmra.mxu1 %v1185_v10 }
 0x2db   :  { %1129 = vmatprep.mubr.msk.f32.mxu1 %vm1399_vm0, %v1398_v0  ;;  %1098 = vmatpush3.msra.mxu1 %v634_v20 }
 0x2dc   :  { %1099 = vmatprep.subr.mxu1 %v1398_v0 }
 0x2dd   :  { %1100 = vmatpush3.msra.mxu1 %v633_v21 }
 0x2de   :  { %1101 = vmatprep.subr.mxu1 %v1398_v0 }
 0x2df   :  { %1102 = vmatpush3.msra.mxu1 %v632_v22 }
 0x2e0   :  { %1103 = vmatprep.subr.mxu1 %v1398_v0 }
 0x2e1   :  { %1104 = vmatpush3.msra.mxu1 %v631_v23 }
 0x2e2   :  { %1105 = vmatprep.subr.mxu1 %v1398_v0 }
 0x2e3   :  { %1106 = vmatpush3.msra.mxu1 %v630_v24 }
 0x2e4   :  { %1107 = vmatprep.subr.mxu1 %v1398_v0 }
 0x2e5   :  { %1108 = vmatpush3.msra.mxu1 %v629_v25 }
 0x2e6   :  { %1109 = vmatprep.subr.mxu1 %v1398_v0 }
 0x2e7   :  { %1110 = vmatpush3.msra.mxu1 %v628_v26 }
 0x2e8   :  { %1111 = vmatprep.subr.mxu1 %v1398_v0 }
 0x2e9   :  { %1112 = vmatpush3.msra.mxu1 %v627_v32 }
 0x2ea   :  { %1113 = vmatprep.subr.mxu1 %v1398_v0 }
 0x2eb   :  { %1114 = vmatpush3.msra.mxu1 %v626_v33 }
 0x2ec   :  { %1115 = vmatprep.subr.mxu1 %v1398_v0 }
 0x2ed   :  { %1116 = vmatpush3.msra.mxu1 %v625_v34 }
 0x2ee   :  { %1117 = vmatprep.subr.mxu1 %v1398_v0 }
 0x2ef   :  { %1118 = vmatpush3.msra.mxu1 %v624_v35 }
 0x2f0   :  { %1119 = vmatprep.subr.mxu1 %v1398_v0 }
 0x2f1   :  { %1120 = vmatpush3.msra.mxu1 %v623_v36 }
 0x2f2   :  { %1121 = vmatprep.subr.mxu1 %v1398_v0 }
 0x2f3   :  { %1122 = vmatpush3.msra.mxu1 %v622_v37 }
 0x2f4   :  { %1123 = vmatprep.subr.mxu1 %v1398_v0 }
 0x2f5   :  { %1124 = vmatpush3.msra.mxu1 %v621_v38 }
 0x2f6   :  { %1125 = vmatprep.subr.mxu1 %v1398_v0 }
 0x2f7   :  { %1126 = vmatpush3.msra.mxu1 %v620_v39 }
 0x2f8   :  { %1127 = vmatprep.subr.mxu1 %v1398_v0 }
 0x2f9   :  { %1128 = vmatpush3.msra.mxu1 %v619_v40 }
 0x39a   :  { %v520_v28 = vpop.f32.mrf.mxu1 }
 0x39b   :  { %v521_v29 = vadd.f32 %v841_v27, %v520_v28 }
 0x39c   :  { %v1061_v30 = vpop.f32.mrf.mxu1 }
 0x39d   :  { %1186 = vtanh.f32 %v521_v29 }
 0x3aa   :  { %v1187_v31 = vpop.eup %1186 }
 0x3ab   :  { %1095 = vmatmul.mubr.f32.vlgmr.msra.gmra.mxu0 %v1187_v31 }
 0x3ac   :  { %1164 = vmatprep.mubr.msk.f32.mxu0 %vm1399_vm0, %v1398_v0  ;;  %1133 = vmatpush3.msra.mxu0 %v728_v41 }
 0x3ad   :  { %1134 = vmatprep.subr.mxu0 %v1398_v0 }
 0x3ae   :  { %1135 = vmatpush3.msra.mxu0 %v727_v42 }
 0x3af   :  { %1136 = vmatprep.subr.mxu0 %v1398_v0 }
 0x3b0   :  { %1137 = vmatpush3.msra.mxu0 %v726_v43 }
 0x3b1   :  { %1138 = vmatprep.subr.mxu0 %v1398_v0 }
 0x3b2   :  { %1139 = vmatpush3.msra.mxu0 %v725_v44 }
 0x3b3   :  { %1140 = vmatprep.subr.mxu0 %v1398_v0 }
 0x3b4   :  { %1141 = vmatpush3.msra.mxu0 %v724_v45 }
 0x3b5   :  { %1142 = vmatprep.subr.mxu0 %v1398_v0 }
 0x3b6   :  { %1143 = vmatpush3.msra.mxu0 %v723_v46 }
 0x3b7   :  { %1144 = vmatprep.subr.mxu0 %v1398_v0 }
 0x3b8   :  { %1145 = vmatpush3.msra.mxu0 %v722_v47 }
 0x3b9   :  { %1146 = vmatprep.subr.mxu0 %v1398_v0 }
 0x3ba   :  { %1147 = vmatpush3.msra.mxu0 %v721_v53 }
 0x3bb   :  { %1148 = vmatprep.subr.mxu0 %v1398_v0 }
 0x3bc   :  { %1149 = vmatpush3.msra.mxu0 %v720_v54 }
 0x3bd   :  { %1150 = vmatprep.subr.mxu0 %v1398_v0 }
 0x3be   :  { %1151 = vmatpush3.msra.mxu0 %v719_v55 }
 0x3bf   :  { %1152 = vmatprep.subr.mxu0 %v1398_v0 }
 0x3c0   :  { %1153 = vmatpush3.msra.mxu0 %v718_v56 }
 0x3c1   :  { %1154 = vmatprep.subr.mxu0 %v1398_v0 }
 0x3c2   :  { %1155 = vmatpush3.msra.mxu0 %v717_v57 }
 0x3c3   :  { %1156 = vmatprep.subr.mxu0 %v1398_v0 }
 0x3c4   :  { %1157 = vmatpush3.msra.mxu0 %v716_v58 }
 0x3c5   :  { %1158 = vmatprep.subr.mxu0 %v1398_v0 }
 0x3c6   :  { %1159 = vmatpush3.msra.mxu0 %v715_v59 }
 0x3c7   :  { %1160 = vmatprep.subr.mxu0 %v1398_v0 }
 0x3c8   :  { %1161 = vmatpush3.msra.mxu0 %v714_v60 }
 0x3c9   :  { %1162 = vmatprep.subr.mxu0 %v1398_v0 }
 0x3ca   :  { %1163 = vmatpush3.msra.mxu0 %v713_v61 }
 0x46b   :  { %v614_v49 = vpop.f32.mrf.mxu0 }
 0x46c   :  { %v615_v50 = vadd.f32 %v842_v48, %v614_v49 }
 0x46d   :  { %v1096_v51 = vpop.f32.mrf.mxu0 }
 0x46e   :  { %1188 = vtanh.f32 %v615_v50 }
 0x47b   :  { %v1189_v52 = vpop.eup %1188 }
 0x47c   :  { %1130 = vmatmul.mubr.f32.vlgmr.msra.gmra.mxu1 %v1189_v52 }
 0x53c   :  { %v708_v63 = vpop.f32.mrf.mxu1 }
 0x53d   :  { %v709_v1 = vadd.f32 %v843_v62, %v708_v63 }
 0x53e   :  { %v1131_v2 = vpop.f32.mrf.mxu1 }
 0x53f   :  { %1190 = vtanh.f32 %v709_v1 }
 0x54c   :  { %v1191_v3 = vpop.eup %1190 }
 0x54d   :  { %1165 = vmatmul.mubr.f32.vlgmr.msra.gmra.mxu0 %v1191_v3 }
 0x60d   :  { %v802_v5 = vpop.f32.mrf.mxu0 }
 0x60e   :  { %v803_v6 = vadd.f32 %v844_v4, %v802_v5 }
 0x60f   :  { %v1166_v7 = vpop.f32.mrf.mxu0 }
 0x610   :  { %806 = vmax.xlane.f32.xlu0 %v803_v6 }
 0x699   :  { %v807_v0 = vpop.xlane.xlu0 %806 }
 0x69a   :  { %v808_v8 = vsub.f32 %v803_v6, %v807_v0 }
 0x69c   :  { %v809_v9 = vmul.f32 1.442695, %v808_v8 }
 0x69e   :  { %1192 = vpow2.f32 %v809_v9 }
 0x6ab   :  { %v1193_v10 = vpop.eup %1192 }
 0x6ac   :  { %811 = vadd.xlane.f32.xlu0 %v1193_v10 }
 0x735   :  { %v812_v11 = vpop.xlane.xlu0 %811 }
 0x736   :  { %1194 = vlog2.f32 %v812_v11 }
 0x743   :  { %v1195_v12 = vpop.eup %1194 }
 0x744   :  { %v814_v13 = vmul.f32 0.6931472, %v1195_v12 }
 0x746   :  { %v815_v14 = vsub.f32 %v808_v8, %v814_v13 }
 0x748   :  { %817 = vst.msk [vmem:[#allocation16] sm:$0xff] %vm816_vm2, %v815_v14 }
 0x749   :  { %1367 = shalt.err (!%p1364_p2)
}
 0x74a   :  { %827 = dma.vmem_to_hbm [thread:$0]  %s825_s30, 128, %s1677_s15, [#allocation4]  }
 0x74b   :  { %1386 = dma.done.wait [#allocation4], 128  }
 0x74c   :  { %1387 = vsyncadd [#allocation4], 4294967168 }
 0x74d   :  { %831 = vsyncpa [#allocation3], 1 }
 0x74e   :  { %832 = vsyncpa [#allocation6], 1 }
 0x74f   :  { %833 = vsyncpa [#allocation9], 1 }
 0x750   :  { %834 = vsyncpa [#allocation12], 1 }
 0x751   :  { %835 = vsyncpa [#allocation15], 1 }
 0x752   :  { %836 = vsyncpa [#allocation4], 1 }

</bundles_post_ra>
